<compile_context>
chip_gen: v7x
topology: tpu7x:2x2x1
jax: 0.10.0
libtpu: 0.0.40
codegen_flags: <defaults>
</compile_context>

<pallas_src>
import jax
import jax.numpy as jnp
from jax.experimental import pallas as pl
from jax.experimental.pallas import tpu as pltpu


def _gcn_kernel(adj_ref, x_ref, wt_ref, b_ref, out_ref):
    # adj_ref: (N, N)      normalized adjacency  D^-1/2 (A+I) D^-1/2
    # x_ref:   (N, Fin)    node features
    # wt_ref:  (Fin, Fout) linear weight, pre-transposed (support = x @ W^T)
    # b_ref:   (1, Fout)   linear bias
    # out_ref: (N, Fout)
    support = jnp.dot(x_ref[...].astype(jnp.float32),
                      wt_ref[...].astype(jnp.float32),
                      preferred_element_type=jnp.float32)        # (N, Fout)
    support = support + b_ref[...].astype(jnp.float32)
    out = jnp.dot(adj_ref[...].astype(jnp.float32), support,
                  preferred_element_type=jnp.float32)            # (N, Fout)
    out_ref[...] = out.astype(out_ref.dtype)


def norm_degs_matrix(edges):
    """D^-1/2 (A + I) D^-1/2 (mirrors GraphConvolution.norm_degs_matrix)."""
    n = edges.shape[0]
    A = edges.astype(jnp.float32) + jnp.eye(n, dtype=jnp.float32)
    deg = A.sum(-1)
    d_inv_sqrt = jax.lax.rsqrt(deg)
    # diag(d) @ A @ diag(d) == elementwise row/col scaling.
    return d_inv_sqrt[:, None] * A * d_inv_sqrt[None, :]


def graph_convolution(x, adj_norm, weight, bias):
    """GraphConvolution forward: A_norm @ (x @ weight.T + bias)."""
    N, Fin = x.shape
    Fout = weight.shape[0]
    wt = weight.T                    # (Fin, Fout)  tiny parameter transpose
    b2 = bias.reshape(1, Fout)

    flops = 2 * N * Fin * Fout + 2 * N * N * Fout
    bytes_accessed = 4 * (N * Fin + Fin * Fout + Fout + N * N + N * Fout)

    out = pl.pallas_call(
        _gcn_kernel,
        out_shape=jax.ShapeDtypeStruct((N, Fout), x.dtype),
        grid_spec=pltpu.PrefetchScalarGridSpec(
            num_scalar_prefetch=0,
            grid=(1,),
            in_specs=[
                pl.BlockSpec((N, N), lambda i: (0, 0)),
                pl.BlockSpec((N, Fin), lambda i: (0, 0)),
                pl.BlockSpec((Fin, Fout), lambda i: (0, 0)),
                pl.BlockSpec((1, Fout), lambda i: (0, 0)),
            ],
            out_specs=pl.BlockSpec((N, Fout), lambda i: (0, 0)),
        ),
        compiler_params=pltpu.CompilerParams(
            dimension_semantics=("arbitrary",)),
        cost_estimate=pl.CostEstimate(
            flops=flops, transcendentals=0, bytes_accessed=bytes_accessed),
    )(adj_norm, x, wt, b2)
    # TODO(synk): for graphs too large for one VMEM tile, tile the output-row
    # axis of adj (parallel grid dim for v7x dual-TC) and compute `support`
    # once into a VMEM scratch on the first step of an 'arbitrary' axis.
    return out


def _reference(x, adj_norm, weight, bias):
    support = x @ weight.T + bias
    return adj_norm @ support


if __name__ == "__main__":
    # Module config: in_features=16, out_features=32, graph with 8 nodes.
    N, Fin, Fout = 8, 16, 32
    key = jax.random.PRNGKey(0)
    ke, kx, kw, kb = jax.random.split(key, 4)

    # Deterministic symmetric binary adjacency, no self loops (+I added in norm).
    r = jax.random.uniform(ke, (N, N))
    edges = (((r + r.T) * 0.5) > 0.5).astype(jnp.float32)
    edges = edges * (1.0 - jnp.eye(N, dtype=jnp.float32))

    x = jax.random.normal(kx, (N, Fin), dtype=jnp.float32)
    weight = jax.random.normal(kw, (Fout, Fin), dtype=jnp.float32) * 0.1
    bias = jax.random.normal(kb, (Fout,), dtype=jnp.float32) * 0.1

    adj_norm = norm_degs_matrix(edges)

    out = jax.block_until_ready(graph_convolution(x, adj_norm, weight, bias))
    ref = _reference(x, adj_norm, weight, bias)

    assert out.shape == (N, Fout)
    assert jnp.allclose(out, ref, atol=1e-5, rtol=1e-5)
    print("KERNEL_OK")
</pallas_src>

<mosaic_0001>
module attributes {stable_mosaic.version = 11 : i64} {
  func.func @_gcn_kernel(%arg0: i32, %arg1: memref<8x8xf32, #tpu.memory_space<vmem>>, %arg2: memref<8x16xf32, #tpu.memory_space<vmem>>, %arg3: memref<16x32xf32, #tpu.memory_space<vmem>>, %arg4: memref<1x32xf32, #tpu.memory_space<vmem>>, %arg5: memref<8x32xf32, #tpu.memory_space<vmem>>) attributes {dimension_semantics = [#tpu.dimension_semantics<arbitrary>], iteration_bounds = array<i64: 1>, scalar_prefetch = 0 : i64, scratch_operands = 0 : i64, tpu.core_type = #tpu.core_type<tc>, window_params = [{pipeline_mode = #tpu.pipeline_mode<synchronous>, transform_indices = @transform_0, window_bounds = array<i64: 8, 8>}, {pipeline_mode = #tpu.pipeline_mode<synchronous>, transform_indices = @transform_1, window_bounds = array<i64: 8, 16>}, {pipeline_mode = #tpu.pipeline_mode<synchronous>, transform_indices = @transform_2, window_bounds = array<i64: 16, 32>}, {pipeline_mode = #tpu.pipeline_mode<synchronous>, transform_indices = @transform_3, window_bounds = array<i64: 1, 32>}, {pipeline_mode = #tpu.pipeline_mode<synchronous>, transform_indices = @transform_4, window_bounds = array<i64: 8, 32>}]} {
    %c0 = arith.constant 0 : index
    %c0_0 = arith.constant 0 : index
    %0 = vector.load %arg2[%c0, %c0_0] : memref<8x16xf32, #tpu.memory_space<vmem>>, vector<8x16xf32>
    %c0_1 = arith.constant 0 : index
    %c0_2 = arith.constant 0 : index
    %1 = vector.load %arg3[%c0_1, %c0_2] : memref<16x32xf32, #tpu.memory_space<vmem>>, vector<16x32xf32>
    %cst = arith.constant dense<0.000000e+00> : vector<8x32xf32>
    %2 = tpu.matmul %0, %1, %cst {dimension_numbers = #tpu.dot_dimension_numbers<[1], [0], [0], [1], [0, 0, 1, 1], [], []>} : vector<8x16xf32>, vector<16x32xf32>, vector<8x32xf32> -> vector<8x32xf32>
    %c0_3 = arith.constant 0 : index
    %c0_4 = arith.constant 0 : index
    %3 = vector.load %arg4[%c0_3, %c0_4] : memref<1x32xf32, #tpu.memory_space<vmem>>, vector<1x32xf32>
    %4 = vector.broadcast %3 : vector<1x32xf32> to vector<8x32xf32>
    %5 = arith.addf %2, %4 : vector<8x32xf32>
    %c0_5 = arith.constant 0 : index
    %c0_6 = arith.constant 0 : index
    %6 = vector.load %arg1[%c0_5, %c0_6] : memref<8x8xf32, #tpu.memory_space<vmem>>, vector<8x8xf32>
    %cst_7 = arith.constant dense<0.000000e+00> : vector<8x32xf32>
    %7 = tpu.matmul %6, %5, %cst_7 {dimension_numbers = #tpu.dot_dimension_numbers<[1], [0], [0], [1], [0, 0, 1, 1], [], []>} : vector<8x8xf32>, vector<8x32xf32>, vector<8x32xf32> -> vector<8x32xf32>
    %c0_8 = arith.constant 0 : index
    %c0_9 = arith.constant 0 : index
    %8 = vector.load %arg5[%c0_8, %c0_9] : memref<8x32xf32, #tpu.memory_space<vmem>>, vector<8x32xf32>
    tpu.vector_store %arg5[%c0_8, %c0_9], %7 {strides = array<i32>} : memref<8x32xf32, #tpu.memory_space<vmem>>, vector<8x32xf32>,
    return
  }
  func.func @transform_0(%arg0: i32) -> (i32, i32) {
    %c0_i32 = arith.constant 0 : i32
    %c0_i32_0 = arith.constant 0 : i32
    %c0_i32_1 = arith.constant 0 : i32
    return %c0_i32, %c0_i32_0 : i32, i32
  }
  func.func @transform_1(%arg0: i32) -> (i32, i32) {
    %c0_i32 = arith.constant 0 : i32
    %c0_i32_0 = arith.constant 0 : i32
    %c0_i32_1 = arith.constant 0 : i32
    return %c0_i32, %c0_i32_0 : i32, i32
  }
  func.func @transform_2(%arg0: i32) -> (i32, i32) {
    %c0_i32 = arith.constant 0 : i32
    %c0_i32_0 = arith.constant 0 : i32
    %c0_i32_1 = arith.constant 0 : i32
    return %c0_i32, %c0_i32_0 : i32, i32
  }
  func.func @transform_3(%arg0: i32) -> (i32, i32) {
    %c0_i32 = arith.constant 0 : i32
    %c0_i32_0 = arith.constant 0 : i32
    %c0_i32_1 = arith.constant 0 : i32
    return %c0_i32, %c0_i32_0 : i32, i32
  }
  func.func @transform_4(%arg0: i32) -> (i32, i32) {
    %c0_i32 = arith.constant 0 : i32
    %c0_i32_0 = arith.constant 0 : i32
    %c0_i32_1 = arith.constant 0 : i32
    return %c0_i32, %c0_i32_0 : i32, i32
  }
}

</mosaic_0001>

<bundles_post_ra>
// kernel: tpu_custom_call.1
= control target key start
LH: loop header
LB: loop body
LE: loop exit
PB: predicated region body
PF: predicated region fallthrough
CT: control target
= control target key end

     0   :  { %9 = vsyncpa [#allocation3], 0  ;;  %s443_s0 = inlined_call_operand.hbm [shape: f32[8,8], index: 0, kind: input, shape index: {}]   ;;  %s444_s1 = inlined_call_operand.hbm [shape: f32[8,16], index: 1, kind: input, shape index: {}]   ;;  %s445_s2 = inlined_call_operand.hbm [shape: f32[16,32], index: 2, kind: input, shape index: {}]   ;;  %s446_s3 = inlined_call_operand.vmem [shape: f32[1,32], index: 3, kind: input, shape index: {}]   ;;  %s447_s4 = inlined_call_operand.hbm [shape: f32[8,32], index: 4, kind: output, shape index: {}]  }
   0x1   :  { %10 = vsyncpa [#allocation6], 0 }
   0x2   :  { %11 = vsyncpa [#allocation4], 0  ;;  %s358_s15 = smov [#allocation5]   ;;  %s359_s17 = smov [#allocation2]  }
   0x3   :  { %s28_s16 = sshll.u32 %s358_s15, 4  ;;  %s18_s18 = sshll.u32 %s359_s17, 4  ;;  %s29_s16 = int_to_ptr.vmem [resolvable:$true] %s28_s16  ;;  %s19_s18 = int_to_ptr.vmem [resolvable:$true] %s18_s18 }
   0x4   :  { %s264_s21 = scalar_lea.hbm %s444_s1, 128 }
   0x5   :  { %p265_p0 = scmp.ne.s32.totalorder %s444_s1, %s264_s21  ;;  %p268_p1 = scmp.lt.u32.totalorder %s264_s21, %s444_s1 }
   0x7   :  { %p270_p2 = pnand %p268_p1, %p265_p0 }
   0x9   :  { %273 = shalt.err (!%p270_p2)
}
   0xa   :  { %s274_s26 = scalar_lea.vmem %s29_s16, 128  ;;  %p279_p4 = scmp.lt.s32.totalorder %s29_s16, %s29_s16 }
   0xb   :  { %p275_p3 = scmp.ne.s32.totalorder %s29_s16, %s274_s26  ;;  %p280_p5 = scmp.lt.s32.totalorder %s274_s26, %s274_s26 }
   0xd   :  { %p281_p6 = por %p280_p5, %p279_p4 }
   0xf   :  { %p282_p7 = pnand %p281_p6, %p275_p3 }
  0x11   :  { %285 = shalt.err (!%p282_p7)
}
  0x12   :  { %31 = dma.hbm_to_vmem [thread:$0]  %s444_s1, 128, %s29_s16, [#allocation6]  }
  0x13   :  { %s286_s5 = scalar_lea.hbm %s443_s0, 128 }
  0x14   :  { %p287_p8 = scmp.ne.s32.totalorder %s443_s0, %s286_s5  ;;  %p290_p9 = scmp.lt.u32.totalorder %s286_s5, %s443_s0 }
  0x16   :  { %p292_p10 = pnand %p290_p9, %p287_p8 }
  0x18   :  { %295 = shalt.err (!%p292_p10)
}
  0x19   :  { %s296_s10 = scalar_lea.vmem %s19_s18, 128  ;;  %p301_p12 = scmp.lt.s32.totalorder %s19_s18, %s19_s18 }
  0x1a   :  { %p297_p11 = scmp.ne.s32.totalorder %s19_s18, %s296_s10  ;;  %p302_p13 = scmp.lt.s32.totalorder %s296_s10, %s296_s10 }
  0x1c   :  { %p303_p0 = por %p302_p13, %p301_p12 }
  0x1e   :  { %p304_p1 = pnand %p303_p0, %p297_p11 }
  0x20   :  { %307 = shalt.err (!%p304_p1)
}
  0x21   :  { %21 = dma.hbm_to_vmem [thread:$0]  %s443_s0, 128, %s19_s18, [#allocation3]  }
  0x22   :  { %s360_s12 = smov [#allocation7]   ;;  %s308_s16 = scalar_lea.hbm %s445_s2, 256 }
  0x23   :  { %s37_s13 = sshll.u32 %s360_s12, 4  ;;  %p309_p2 = scmp.ne.s32.totalorder %s445_s2, %s308_s16  ;;  %s38_s13 = int_to_ptr.vmem [resolvable:$true] %s37_s13 }
  0x24   :  { %p312_p3 = scmp.lt.u32.totalorder %s308_s16, %s445_s2 }
  0x26   :  { %p314_p4 = pnand %p312_p3, %p309_p2 }
  0x28   :  { %317 = shalt.err (!%p314_p4)
}
  0x29   :  { %s318_s22 = scalar_lea.vmem %s38_s13, 256  ;;  %p323_p6 = scmp.lt.s32.totalorder %s38_s13, %s38_s13 }
  0x2a   :  { %p319_p5 = scmp.ne.s32.totalorder %s38_s13, %s318_s22  ;;  %p324_p7 = scmp.lt.s32.totalorder %s318_s22, %s318_s22 }
  0x2c   :  { %p325_p8 = por %p324_p7, %p323_p6 }
  0x2e   :  { %p326_p9 = pnand %p325_p8, %p319_p5 }
  0x30   :  { %329 = shalt.err (!%p326_p9)
}
  0x31   :  { %s361_s0 = smov 128   ;;  %s362_s18 = smov 8  }
  0x32   :  { %43 = dma.hbm_to_vmem [thread:$0]  %s445_s2, 256, %s38_s13, [#allocation6], %s361_s0, %s361_s0, %s362_s18  }
  0x33   :  { %352 = dma.done.wait [#allocation3], 128  }
  0x34   :  { %353 = vsyncadd [#allocation3], 4294967168 }
  0x35   :  { %354 = dma.done.wait [#allocation6], 384  }
  0x36   :  { %355 = vsyncadd [#allocation6], 4294966912  ;;  %v363_v0 = vmov 0.0|0.0   ;;  %vm364_vm0 = vmmov 0   ;;  %v365_v1 = vmov 0.0   ;;  %v56_v2 = vld [vmem:[#allocation7] sm:$0xff] }
  0x37   :  { %252 = vmatprep.subr.bf16.mxu0 %v363_v0  ;;  %244 = vmatprep.mubr.msk.f32.mxu0 %vm364_vm0, %v365_v1  ;;  %v57_v3 = vld [vmem:[#allocation7 + $0x8] sm:$0xff]  ;;  %v55_v5 = vld [vmem:[#allocation5] sm:$0xff]  ;;  %vm65_vm1 = vcmask 130048   ;;  %v232_v6 = vld [vmem:[%s446_s3] ss:$0 sm:$0xff]  ;;  %vm140_vm2 = vcmask 64512  }
  0x38   :  { %247 = vmatprep.subr.mxu1 %v365_v1  ;;  %249 = vmatprep.mubr.msk.f32.mxu1 %vm364_vm0, %v365_v1  ;;  %v253_v4 = vpack.c.bf16 %v57_v3, %v56_v2  ;;  %v139_v10 = vld [vmem:[#allocation2] sm:$0xff]  ;;  %s366_s26 = smov [#allocation8]   ;;  %vm214_vm3 = vcmask 261120  }
  0x39   :  { %s222_s27 = sshll.u32 %s366_s26, 4  ;;  %s223_s27 = int_to_ptr.vmem [resolvable:$true] %s222_s27 }
  0x3a   :  { %254 = vmatpush3.bf16.msra.mxu0 %v253_v4  ;;  %s330_s28 = scalar_lea.vmem %s223_s27, 128  ;;  %p335_p11 = scmp.lt.s32.totalorder %s223_s27, %s223_s27 }
  0x3b   :  { %p331_p10 = scmp.ne.s32.totalorder %s223_s27, %s330_s28  ;;  %p336_p12 = scmp.lt.s32.totalorder %s330_s28, %s330_s28 }
  0x3d   :  { %245 = vmatmul.mubr.msk.f32.vlgmr.msra.gmra.mrb[0].mxu0 %vm65_vm1, %v55_v5  ;;  %p337_p13 = por %p336_p12, %p335_p11 }
  0x3f   :  { %p338_p0 = pnand %p337_p13, %p331_p10 }
 0x110   :  { %v135_v7 = vpop.f32.mrb[0].mxu0 }
 0x111   :  { %v136_v8 = vadd.f32 %v232_v6, %v135_v7  ;;  %v246_v9 = vpop.f32.mrb[1].mxu0 }
 0x113   :  { %248 = vmatpush3.msra.mxu1 %v136_v8 }
 0x114   :  { %250 = vmatmul.mubr.msk.f32.vlgmr.msra.gmra.mrb[0].mxu1 %vm140_vm2, %v139_v10 }
 0x1e7   :  { %v210_v11 = vpop.f32.mrb[0].mxu1 }
 0x1e8   :  { %v251_v12 = vpop.f32.mrb[1].mxu1  ;;  %215 = vst.msk [vmem:[#allocation8] sm:$0xff] %vm214_vm3, %v210_v11 }
 0x1e9   :  { %341 = shalt.err (!%p338_p0)
}
 0x1ea   :  { %s342_s30 = scalar_lea.hbm %s447_s4, 128 }
 0x1eb   :  { %p343_p1 = scmp.ne.s32.totalorder %s447_s4, %s342_s30  ;;  %p346_p2 = scmp.lt.u32.totalorder %s342_s30, %s447_s4 }
 0x1ed   :  { %p348_p3 = pnand %p346_p2, %p343_p1 }
 0x1ef   :  { %351 = shalt.err (!%p348_p3)
}
 0x1f0   :  { %225 = dma.vmem_to_hbm [thread:$0]  %s223_s27, 128, %s447_s4, [#allocation4]  }
 0x1f1   :  { %356 = dma.done.wait [#allocation4], 128  }
 0x1f2   :  { %357 = vsyncadd [#allocation4], 4294967168 }
 0x1f3   :  { %229 = vsyncpa [#allocation3], 1 }
 0x1f4   :  { %230 = vsyncpa [#allocation6], 1 }
 0x1f5   :  { %231 = vsyncpa [#allocation4], 1 }

</bundles_post_ra>
